<compile_context>
chip_gen: v7x
topology: tpu7x:2x2x1
jax: 0.10.0
libtpu: 0.0.40
codegen_flags: <defaults>
</compile_context>

<pallas_src>
import jax
import jax.numpy as jnp
from jax.experimental import pallas as pl
from jax.experimental.pallas import tpu as pltpu

Z_DIM = 64
HIDDEN = 256
IMAGE_DIM = 28 * 28 * 1          # 784
IMAGE_DIM_PAD = 7 * 128          # 896: padded layer-3 matmul width (MXU-friendly)
TILE_B_MAX = 512                 # max batch tile (multiple of 16)


def _generator_kernel(x_ref, w1_ref, b1_ref, w2_ref, b2_ref, w3_ref, b3_ref, o_ref):
    # fp32 -> bf16 cast fused into the kernel (free VPU op, hidden under DMA).
    x = x_ref[...].astype(jnp.bfloat16)

    # Layer 1: Linear(64 -> 256) + ReLU   (bf16 MXU operands, fp32 accumulation)
    h1 = jnp.dot(x, w1_ref[...], preferred_element_type=jnp.float32)
    h1 = jnp.maximum(h1 + b1_ref[...], 0.0).astype(jnp.bfloat16)

    # Layer 2: Linear(256 -> 256) + ReLU
    h2 = jnp.dot(h1, w2_ref[...], preferred_element_type=jnp.float32)
    h2 = jnp.maximum(h2 + b2_ref[...], 0.0).astype(jnp.bfloat16)

    # Layer 3: Linear(256 -> 896 padded) -> slice back to 784 in-register,
    # bias + tanh in bf16 (packed-rate EUP on v6e/v7x), bf16 lane-dense store.
    h3 = jnp.dot(h2, w3_ref[...], preferred_element_type=jnp.float32)
    y = jnp.tanh((h3[:, :IMAGE_DIM] + b3_ref[...]).astype(jnp.bfloat16))
    o_ref[...] = y.astype(o_ref.dtype)


def _pick_tile_b(batch):
    """Batch tile: multiple of 16 (bf16 sublane packing), capped at TILE_B_MAX,
    and >= 2 grid steps for medium/large batches (v7x megacore sharding)."""
    rounded = max(16, ((batch + 15) // 16) * 16)
    if rounded <= 32:
        return rounded
    half = ((rounded // 2) + 15) // 16 * 16
    return min(TILE_B_MAX, half)


def generator_forward(x, params):
    """x: (batch, z_dim) float32; params: bf16 weights (w3 padded to 896 cols),
    fp32 biases (b3 unpadded). Returns (batch, 784) bfloat16."""
    w1, b1, w2, b2, w3, b3 = (
        params["w1"], params["b1"], params["w2"],
        params["b2"], params["w3"], params["b3"],
    )
    batch = x.shape[0]

    tile_b = _pick_tile_b(batch)
    padded_batch = pl.cdiv(batch, tile_b) * tile_b

    x_in = x
    if padded_batch != batch:
        x_in = jnp.pad(x, ((0, padded_batch - batch), (0, 0)))

    grid = (padded_batch // tile_b,)

    # Streamed tiles (indexed by the batch grid axis).
    x_spec = pl.BlockSpec((tile_b, Z_DIM), lambda i: (i, 0))
    o_spec = pl.BlockSpec((tile_b, IMAGE_DIM), lambda i: (i, 0))
    # Weights/biases: full-array blocks, same block every step -> VMEM-resident.
    resident = lambda shape: pl.BlockSpec(shape, lambda i: tuple(0 for _ in shape))

    out = pl.pallas_call(
        _generator_kernel,
        out_shape=jax.ShapeDtypeStruct((padded_batch, IMAGE_DIM), jnp.bfloat16),
        grid=grid,
        in_specs=[
            x_spec,
            resident(w1.shape), resident(b1.shape),
            resident(w2.shape), resident(b2.shape),
            resident(w3.shape), resident(b3.shape),
        ],
        out_specs=o_spec,
        compiler_params=pltpu.CompilerParams(
            dimension_semantics=("parallel",),   # shards batch across v7x's 2 TCs
        ),
    )(x_in, w1, b1, w2, b2, w3, b3)

    if padded_batch != batch:
        out = out[:batch]
    return out


def init_params(key):
    """PyTorch nn.Linear default init (U(-1/sqrt(fan_in), +)).
    Weights stored transposed (in, out), cast to bf16; w3 padded to 896 cols,
    biases fp32 with b3 left unpadded at 784."""
    def linear(key, fan_in, fan_out):
        kw, kb = jax.random.split(key)
        bound = 1.0 / jnp.sqrt(fan_in)
        w = jax.random.uniform(kw, (fan_in, fan_out), jnp.float32, -bound, bound)
        b = jax.random.uniform(kb, (1, fan_out), jnp.float32, -bound, bound)
        return w, b

    k1, k2, k3 = jax.random.split(key, 3)
    w1, b1 = linear(k1, Z_DIM, HIDDEN)
    w2, b2 = linear(k2, HIDDEN, HIDDEN)
    w3, b3 = linear(k3, HIDDEN, IMAGE_DIM)

    pad = IMAGE_DIM_PAD - IMAGE_DIM
    w3p = jnp.pad(w3, ((0, 0), (0, pad)))

    return {
        "w1": w1.astype(jnp.bfloat16), "b1": b1,
        "w2": w2.astype(jnp.bfloat16), "b2": b2,
        "w3": w3p.astype(jnp.bfloat16), "b3": b3,
    }


def _reference(x, p):
    """Pure-JAX fp32 reference using the same (bf16-quantized) weights."""
    w1 = p["w1"].astype(jnp.float32)
    w2 = p["w2"].astype(jnp.float32)
    w3 = p["w3"].astype(jnp.float32)[:, :IMAGE_DIM]
    h1 = jnp.maximum(x @ w1 + p["b1"], 0.0)
    h2 = jnp.maximum(h1 @ w2 + p["b2"], 0.0)
    return jnp.tanh(h2 @ w3 + p["b3"])


if __name__ == "__main__":
    key = jax.random.PRNGKey(0)
    k_params, k_x = jax.random.split(key)

    params = init_params(k_params)
    batch = 8
    x = jax.random.normal(k_x, (batch, Z_DIM), jnp.float32)

    out = generator_forward(x, params)
    out = jax.block_until_ready(out)

    ref = _reference(x, params)
    assert out.shape == (batch, IMAGE_DIM), out.shape
    assert out.dtype == jnp.bfloat16, out.dtype
    # Tolerance loosened vs fp32: bf16 matmul operands, bf16 inter-layer
    # activations, bf16 tanh epilogue and bf16 output are a deliberate
    # precision trade (outputs are tanh-bounded).
    assert jnp.allclose(out.astype(jnp.float32), ref, atol=2e-2, rtol=2e-2), \
        "mismatch vs JAX reference"

    print("KERNEL_OK")
</pallas_src>

<mosaic_0001>
module attributes {stable_mosaic.version = 11 : i64} {
  func.func @_generator_kernel(%arg0: i32, %arg1: memref<16x64xf32, #tpu.memory_space<vmem>>, %arg2: memref<64x256xbf16, #tpu.memory_space<vmem>>, %arg3: memref<1x256xf32, #tpu.memory_space<vmem>>, %arg4: memref<256x256xbf16, #tpu.memory_space<vmem>>, %arg5: memref<1x256xf32, #tpu.memory_space<vmem>>, %arg6: memref<256x896xbf16, #tpu.memory_space<vmem>>, %arg7: memref<1x784xf32, #tpu.memory_space<vmem>>, %arg8: memref<16x784xbf16, #tpu.memory_space<vmem>>) attributes {dimension_semantics = [#tpu.dimension_semantics<parallel>], iteration_bounds = array<i64: 1>, scalar_prefetch = 0 : i64, scratch_operands = 0 : i64, tpu.core_type = #tpu.core_type<tc>, window_params = [{transform_indices = @transform_0, window_bounds = array<i64: 16, 64>}, {pipeline_mode = #tpu.pipeline_mode<synchronous>, transform_indices = @transform_1, window_bounds = array<i64: 64, 256>}, {pipeline_mode = #tpu.pipeline_mode<synchronous>, transform_indices = @transform_2, window_bounds = array<i64: 1, 256>}, {pipeline_mode = #tpu.pipeline_mode<synchronous>, transform_indices = @transform_3, window_bounds = array<i64: 256, 256>}, {pipeline_mode = #tpu.pipeline_mode<synchronous>, transform_indices = @transform_4, window_bounds = array<i64: 1, 256>}, {pipeline_mode = #tpu.pipeline_mode<synchronous>, transform_indices = @transform_5, window_bounds = array<i64: 256, 896>}, {pipeline_mode = #tpu.pipeline_mode<synchronous>, transform_indices = @transform_6, window_bounds = array<i64: 1, 784>}, {transform_indices = @transform_7, window_bounds = array<i64: 16, 784>}]} {
    %c0 = arith.constant 0 : index
    %c0_0 = arith.constant 0 : index
    %0 = vector.load %arg1[%c0, %c0_0] : memref<16x64xf32, #tpu.memory_space<vmem>>, vector<16x64xf32>
    %1 = arith.truncf %0 : vector<16x64xf32> to vector<16x64xbf16>
    %c0_1 = arith.constant 0 : index
    %c0_2 = arith.constant 0 : index
    %2 = vector.load %arg2[%c0_1, %c0_2] : memref<64x256xbf16, #tpu.memory_space<vmem>>, vector<64x256xbf16>
    %cst = arith.constant dense<0.000000e+00> : vector<16x256xf32>
    %3 = tpu.matmul %1, %2, %cst {dimension_numbers = #tpu.dot_dimension_numbers<[1], [0], [0], [1], [0, 0, 1, 1], [], []>} : vector<16x64xbf16>, vector<64x256xbf16>, vector<16x256xf32> -> vector<16x256xf32>
    %c0_3 = arith.constant 0 : index
    %c0_4 = arith.constant 0 : index
    %4 = vector.load %arg3[%c0_3, %c0_4] : memref<1x256xf32, #tpu.memory_space<vmem>>, vector<1x256xf32>
    %5 = vector.broadcast %4 : vector<1x256xf32> to vector<16x256xf32>
    %6 = arith.addf %3, %5 : vector<16x256xf32>
    %cst_5 = arith.constant 0.000000e+00 : f32
    %7 = vector.broadcast %cst_5 : f32 to vector<16x256xf32>
    %8 = arith.maximumf %6, %7 : vector<16x256xf32>
    %9 = arith.truncf %8 : vector<16x256xf32> to vector<16x256xbf16>
    %c0_6 = arith.constant 0 : index
    %c0_7 = arith.constant 0 : index
    %10 = vector.load %arg4[%c0_6, %c0_7] : memref<256x256xbf16, #tpu.memory_space<vmem>>, vector<256x256xbf16>
    %cst_8 = arith.constant dense<0.000000e+00> : vector<16x256xf32>
    %11 = tpu.matmul %9, %10, %cst_8 {dimension_numbers = #tpu.dot_dimension_numbers<[1], [0], [0], [1], [0, 0, 1, 1], [], []>} : vector<16x256xbf16>, vector<256x256xbf16>, vector<16x256xf32> -> vector<16x256xf32>
    %c0_9 = arith.constant 0 : index
    %c0_10 = arith.constant 0 : index
    %12 = vector.load %arg5[%c0_9, %c0_10] : memref<1x256xf32, #tpu.memory_space<vmem>>, vector<1x256xf32>
    %13 = vector.broadcast %12 : vector<1x256xf32> to vector<16x256xf32>
    %14 = arith.addf %11, %13 : vector<16x256xf32>
    %cst_11 = arith.constant 0.000000e+00 : f32
    %15 = vector.broadcast %cst_11 : f32 to vector<16x256xf32>
    %16 = arith.maximumf %14, %15 : vector<16x256xf32>
    %17 = arith.truncf %16 : vector<16x256xf32> to vector<16x256xbf16>
    %c0_12 = arith.constant 0 : index
    %c0_13 = arith.constant 0 : index
    %18 = vector.load %arg6[%c0_12, %c0_13] : memref<256x896xbf16, #tpu.memory_space<vmem>>, vector<256x896xbf16>
    %cst_14 = arith.constant dense<0.000000e+00> : vector<16x896xf32>
    %19 = tpu.matmul %17, %18, %cst_14 {dimension_numbers = #tpu.dot_dimension_numbers<[1], [0], [0], [1], [0, 0, 1, 1], [], []>} : vector<16x256xbf16>, vector<256x896xbf16>, vector<16x896xf32> -> vector<16x896xf32>
    %20 = vector.extract_strided_slice %19 {offsets = [0, 0], sizes = [16, 784], strides = [1, 1]} : vector<16x896xf32> to vector<16x784xf32>
    %c0_15 = arith.constant 0 : index
    %c0_16 = arith.constant 0 : index
    %21 = vector.load %arg7[%c0_15, %c0_16] : memref<1x784xf32, #tpu.memory_space<vmem>>, vector<1x784xf32>
    %22 = vector.broadcast %21 : vector<1x784xf32> to vector<16x784xf32>
    %23 = arith.addf %20, %22 : vector<16x784xf32>
    %24 = arith.truncf %23 : vector<16x784xf32> to vector<16x784xbf16>
    %25 = math.tanh %24 : vector<16x784xbf16>
    %c0_17 = arith.constant 0 : index
    %c0_18 = arith.constant 0 : index
    %26 = vector.load %arg8[%c0_17, %c0_18] : memref<16x784xbf16, #tpu.memory_space<vmem>>, vector<16x784xbf16>
    tpu.vector_store %arg8[%c0_17, %c0_18], %25 {strides = array<i32>} : memref<16x784xbf16, #tpu.memory_space<vmem>>, vector<16x784xbf16>,
    return
  }
  func.func @transform_0(%arg0: i32) -> (i32, i32) {
    %c0_i32 = arith.constant 0 : i32
    %c0_i32_0 = arith.constant 0 : i32
    return %arg0, %c0_i32 : i32, i32
  }
  func.func @transform_1(%arg0: i32) -> (i32, i32) {
    %c0_i32 = arith.constant 0 : i32
    %c0_i32_0 = arith.constant 0 : i32
    %c0_i32_1 = arith.constant 0 : i32
    return %c0_i32, %c0_i32_0 : i32, i32
  }
  func.func @transform_2(%arg0: i32) -> (i32, i32) {
    %c0_i32 = arith.constant 0 : i32
    %c0_i32_0 = arith.constant 0 : i32
    %c0_i32_1 = arith.constant 0 : i32
    return %c0_i32, %c0_i32_0 : i32, i32
  }
  func.func @transform_3(%arg0: i32) -> (i32, i32) {
    %c0_i32 = arith.constant 0 : i32
    %c0_i32_0 = arith.constant 0 : i32
    %c0_i32_1 = arith.constant 0 : i32
    return %c0_i32, %c0_i32_0 : i32, i32
  }
  func.func @transform_4(%arg0: i32) -> (i32, i32) {
    %c0_i32 = arith.constant 0 : i32
    %c0_i32_0 = arith.constant 0 : i32
    %c0_i32_1 = arith.constant 0 : i32
    return %c0_i32, %c0_i32_0 : i32, i32
  }
  func.func @transform_5(%arg0: i32) -> (i32, i32) {
    %c0_i32 = arith.constant 0 : i32
    %c0_i32_0 = arith.constant 0 : i32
    %c0_i32_1 = arith.constant 0 : i32
    return %c0_i32, %c0_i32_0 : i32, i32
  }
  func.func @transform_6(%arg0: i32) -> (i32, i32) {
    %c0_i32 = arith.constant 0 : i32
    %c0_i32_0 = arith.constant 0 : i32
    %c0_i32_1 = arith.constant 0 : i32
    return %c0_i32, %c0_i32_0 : i32, i32
  }
  func.func @transform_7(%arg0: i32) -> (i32, i32) {
    %c0_i32 = arith.constant 0 : i32
    %c0_i32_0 = arith.constant 0 : i32
    return %arg0, %c0_i32 : i32, i32
  }
}

</mosaic_0001>

<bundles_post_ra>
// kernel: tpu_custom_call.1
= control target key start
LH: loop header
LB: loop body
LE: loop exit
PB: predicated region body
PF: predicated region fallthrough
CT: control target
= control target key end

     0   :  { %12 = vsyncpa [#allocation3], 0  ;;  %s2183_s0 = inlined_call_operand.hbm [shape: f32[16,64], index: 0, kind: input, shape index: {}]   ;;  %s2184_s1 = inlined_call_operand.hbm [shape: bf16[64,256], index: 1, kind: input, shape index: {}]   ;;  %s2185_s2 = inlined_call_operand.vmem [shape: f32[1,256], index: 2, kind: input, shape index: {}]   ;;  %s2186_s3 = inlined_call_operand.hbm [shape: bf16[256,256], index: 3, kind: input, shape index: {}]   ;;  %s2187_s4 = inlined_call_operand.vmem [shape: f32[1,256], index: 4, kind: input, shape index: {}]   ;;  %s2188_s5 = inlined_call_operand.hbm [shape: bf16[256,896], index: 5, kind: input, shape index: {}]   ;;  %s2189_s6 = inlined_call_operand.vmem [shape: f32[1,784], index: 6, kind: input, shape index: {}]   ;;  %s2190_s7 = inlined_call_operand.hbm [shape: bf16[16,784], index: 7, kind: output, shape index: {}]  }
   0x1   :  { %13 = vsyncpa [#allocation6], 0 }
   0x2   :  { %14 = vsyncpa [#allocation9], 0 }
   0x3   :  { %15 = vsyncpa [#allocation4], 0  ;;  %s2001_s24 = smov [#allocation5]   ;;  %s2002_s26 = smov [#allocation2]  }
   0x4   :  { %s33_s25 = sshll.u32 %s2001_s24, 4  ;;  %s21_s27 = sshll.u32 %s2002_s26, 4  ;;  %s34_s25 = int_to_ptr.vmem [resolvable:$true] %s33_s25  ;;  %s2051_s27 = int_to_ptr.vmem [resolvable:$true] %s21_s27 }
   0x5   :  { %s1883_s30 = scalar_lea.hbm %s2184_s1, 1024 }
   0x6   :  { %p1884_p0 = scmp.ne.s32.totalorder %s2184_s1, %s1883_s30  ;;  %p1887_p1 = scmp.lt.u32.totalorder %s1883_s30, %s2184_s1 }
   0x8   :  { %p1889_p2 = pnand %p1887_p1, %p1884_p0 }
   0xa   :  { %1892 = shalt.err (!%p1889_p2)
}
   0xb   :  { %s1893_s12 = scalar_lea.vmem %s34_s25, 1024  ;;  %p1898_p4 = scmp.lt.s32.totalorder %s34_s25, %s34_s25 }
   0xc   :  { %p1894_p3 = scmp.ne.s32.totalorder %s34_s25, %s1893_s12  ;;  %p1899_p5 = scmp.lt.s32.totalorder %s1893_s12, %s1893_s12 }
   0xe   :  { %p1900_p6 = por %p1899_p5, %p1898_p4 }
  0x10   :  { %p1901_p7 = pnand %p1900_p6, %p1894_p3 }
  0x12   :  { %1904 = shalt.err (!%p1901_p7)
}
  0x13   :  { %s2003_s13 = smov 128   ;;  %s2004_s14 = smov 8  }
  0x14   :  { %39 = dma.hbm_to_vmem [thread:$0]  %s2184_s1, 1024, %s34_s25, [#allocation6], %s2003_s13, %s2003_s13, %s2004_s14  }
  0x15   :  { %s1905_s19 = scalar_lea.hbm %s2183_s0, 256 }
  0x16   :  { %p1906_p8 = scmp.ne.s32.totalorder %s2183_s0, %s1905_s19  ;;  %p1909_p9 = scmp.lt.u32.totalorder %s1905_s19, %s2183_s0 }
  0x18   :  { %p1911_p10 = pnand %p1909_p9, %p1906_p8 }
  0x1a   :  { %1914 = shalt.err (!%p1911_p10)
}
  0x1b   :  { %s1915_s24 = scalar_lea.vmem %s2051_s27, 256  ;;  %p1920_p12 = scmp.lt.s32.totalorder %s2051_s27, %s2051_s27 }
  0x1c   :  { %p1916_p11 = scmp.ne.s32.totalorder %s2051_s27, %s1915_s24  ;;  %p1921_p13 = scmp.lt.s32.totalorder %s1915_s24, %s1915_s24 }
  0x1e   :  { %p1922_p0 = por %p1921_p13, %p1920_p12 }
  0x20   :  { %p1923_p1 = pnand %p1922_p0, %p1916_p11 }
  0x22   :  { %1926 = shalt.err (!%p1923_p1)
}
  0x23   :  { %27 = dma.hbm_to_vmem [thread:$0]  %s2183_s0, 256, %s2051_s27, [#allocation3], %s2003_s13, %s2003_s13, %s2004_s14  }
  0x24   :  { %s2005_s26 = smov [#allocation7]   ;;  %s2006_s29 = smov [#allocation8]  }
  0x25   :  { %s47_s28 = sshll.u32 %s2005_s26, 4  ;;  %s61_s30 = sshll.u32 %s2006_s29, 4  ;;  %s48_s28 = int_to_ptr.vmem [resolvable:$true] %s47_s28  ;;  %s2088_s30 = int_to_ptr.vmem [resolvable:$true] %s61_s30 }
  0x26   :  { %s1927_s10 = scalar_lea.hbm %s2186_s3, 4096 }
  0x27   :  { %p1928_p2 = scmp.ne.s32.totalorder %s2186_s3, %s1927_s10  ;;  %p1931_p3 = scmp.lt.u32.totalorder %s1927_s10, %s2186_s3 }
  0x29   :  { %p1933_p4 = pnand %p1931_p3, %p1928_p2 }
  0x2b   :  { %1936 = shalt.err (!%p1933_p4)
}
  0x2c   :  { %s1937_s0 = scalar_lea.vmem %s48_s28, 4096  ;;  %p1942_p6 = scmp.lt.s32.totalorder %s48_s28, %s48_s28 }
  0x2d   :  { %p1938_p5 = scmp.ne.s32.totalorder %s48_s28, %s1937_s0  ;;  %p1943_p7 = scmp.lt.s32.totalorder %s1937_s0, %s1937_s0 }
  0x2f   :  { %p1944_p8 = por %p1943_p7, %p1942_p6 }
  0x31   :  { %p1945_p9 = pnand %p1944_p8, %p1938_p5 }
  0x33   :  { %1948 = shalt.err (!%p1945_p9)
}
  0x34   :  { %53 = dma.hbm_to_vmem [thread:$0]  %s2186_s3, 4096, %s48_s28, [#allocation6], %s2003_s13, %s2003_s13, %s2004_s14  }
  0x35   :  { %s1949_s20 = scalar_lea.hbm %s2188_s5, 14336 }
  0x36   :  { %p1950_p10 = scmp.ne.s32.totalorder %s2188_s5, %s1949_s20  ;;  %p1953_p11 = scmp.lt.u32.totalorder %s1949_s20, %s2188_s5 }
  0x38   :  { %p1955_p12 = pnand %p1953_p11, %p1950_p10 }
  0x3a   :  { %1958 = shalt.err (!%p1955_p12)
}
  0x3b   :  { %s1959_s1 = scalar_lea.vmem %s2088_s30, 14336  ;;  %p1964_p0 = scmp.lt.s32.totalorder %s2088_s30, %s2088_s30 }
  0x3c   :  { %p1960_p13 = scmp.ne.s32.totalorder %s2088_s30, %s1959_s1  ;;  %p1965_p1 = scmp.lt.s32.totalorder %s1959_s1, %s1959_s1 }
  0x3e   :  { %p1966_p2 = por %p1965_p1, %p1964_p0 }
  0x40   :  { %p1967_p3 = pnand %p1966_p2, %p1960_p13 }
  0x42   :  { %1970 = shalt.err (!%p1967_p3)
}
  0x43   :  { %s2007_s3 = smov 448   ;;  %s2008_s13 = smov 28  }
  0x44   :  { %67 = dma.hbm_to_vmem [thread:$0]  %s2188_s5, 14336, %s2088_s30, [#allocation9], %s2007_s3, %s2007_s3, %s2008_s13  }
  0x45   :  { %1993 = dma.done.wait [#allocation3], 256  }
  0x46   :  { %1994 = vsyncadd [#allocation3], 4294967040 }
  0x47   :  { %1995 = dma.done.wait [#allocation6], 5120  }
  0x48   :  { %1996 = vsyncadd [#allocation6], 4294962176 }
  0x49   :  { %1997 = dma.done.wait [#allocation9], 14336  }
  0x4a   :  { %1998 = vsyncadd [#allocation9], 4294952960  ;;  %v2009_v0 = vmov 0   ;;  %v1649_v1 = vld [vmem:[#allocation5 + $0x4] ss:$8 sps:$4 sm:$0xff]   ;;  %v83_v12 = vld [vmem:[#allocation2] sm:$0xff] }
  0x4b   :  { %182 = vmatprep.mubr.bf16.mxu0 %v2009_v0  ;;  %v1651_v2 = vld [vmem:[#allocation5] ss:$8 sps:$4 sm:$0xff]   ;;  %150 = vmatprep.subr.bf16.mxu0 %v1649_v1  ;;  %v1652_v3 = vld [vmem:[#allocation5 + $0x14] ss:$8 sps:$4 sm:$0xff]   ;;  %v1654_v4 = vld [vmem:[#allocation5 + $0x10] ss:$8 sps:$4 sm:$0xff]  }
  0x4c   :  { %151 = vmatpush1.bf16.msra.mxu0 %v1651_v2  ;;  %v1655_v5 = vld [vmem:[#allocation5 + $0x24] ss:$8 sps:$4 sm:$0xff]   ;;  %v1657_v6 = vld [vmem:[#allocation5 + $0x20] ss:$8 sps:$4 sm:$0xff]   ;;  %v1658_v9 = vld [vmem:[#allocation5 + $0x34] ss:$8 sps:$4 sm:$0xff]  }
  0x4d   :  { %152 = vmatprep.subr.bf16.mxu0 %v1652_v3  ;;  %v1661_v7 = vld [vmem:[#allocation7 + $0x4] ss:$8 sps:$4 sm:$0xff]   ;;  %v1663_v8 = vld [vmem:[#allocation7] ss:$8 sps:$4 sm:$0xff]   ;;  %v1664_v10 = vld [vmem:[#allocation7 + $0x14] ss:$8 sps:$4 sm:$0xff]  }
  0x4e   :  { %403 = vmatprep.subr.bf16.mxu1 %v1661_v7  ;;  %v1660_v11 = vld [vmem:[#allocation5 + $0x30] ss:$8 sps:$4 sm:$0xff]   ;;  %v1667_v14 = vld [vmem:[#allocation7 + $0x24] ss:$8 sps:$4 sm:$0xff]   ;;  %v1669_v16 = vld [vmem:[#allocation7 + $0x20] ss:$8 sps:$4 sm:$0xff]  }
  0x4f   :  { %404 = vmatpush1.bf16.msra.mxu1 %v1663_v8  ;;  %v1666_v13 = vld [vmem:[#allocation7 + $0x10] ss:$8 sps:$4 sm:$0xff]   ;;  %v1670_v18 = vld [vmem:[#allocation7 + $0x34] ss:$8 sps:$4 sm:$0xff]   ;;  %vm146_vm0 = vcmask 523264   ;;  %vm1431_vm1 = vcmask 125952  }
  0x50   :  { %153 = vmatpush1.bf16.msra.mxu0 %v1654_v4  ;;  %405 = vmatprep.subr.bf16.mxu1 %v1664_v10  ;;  %v84_v15 = vld [vmem:[#allocation2 + $0x8] sm:$0xff]  ;;  %v1673_v20 = vld [vmem:[#allocation7 + $0x44] ss:$8 sps:$4 sm:$0xff]   ;;  %v1675_v21 = vld [vmem:[#allocation7 + $0x40] ss:$8 sps:$4 sm:$0xff]  }
  0x51   :  { %154 = vmatprep.subr.bf16.mxu0 %v1655_v5  ;;  %v85_v17 = vpack.c.bf16 %v84_v15, %v83_v12  ;;  %v1672_v19 = vld [vmem:[#allocation7 + $0x30] ss:$8 sps:$4 sm:$0xff]   ;;  %v1676_v22 = vld [vmem:[#allocation7 + $0x54] ss:$8 sps:$4 sm:$0xff]   ;;  %v1679_v24 = vld [vmem:[#allocation7 + $0x64] ss:$8 sps:$4 sm:$0xff]  }
  0x52   :  { %v1678_v23 = vld [vmem:[#allocation7 + $0x50] ss:$8 sps:$4 sm:$0xff]   ;;  %v1681_v25 = vld [vmem:[#allocation7 + $0x60] ss:$8 sps:$4 sm:$0xff]   ;;  %v1682_v26 = vld [vmem:[#allocation7 + $0x74] ss:$8 sps:$4 sm:$0xff]  }
  0x53   :  { %406 = vmatpush1.bf16.msra.mxu1 %v1666_v13  ;;  %v1684_v27 = vld [vmem:[#allocation7 + $0x70] ss:$8 sps:$4 sm:$0xff]   ;;  %v1685_v28 = vld [vmem:[#allocation7 + $0x84] ss:$8 sps:$4 sm:$0xff]   ;;  %v1687_v29 = vld [vmem:[#allocation7 + $0x80] ss:$8 sps:$4 sm:$0xff]  }
  0x54   :  { %155 = vmatpush1.bf16.msra.mxu0 %v1657_v6  ;;  %407 = vmatprep.subr.bf16.mxu1 %v1667_v14  ;;  %v1688_v30 = vld [vmem:[#allocation7 + $0x94] ss:$8 sps:$4 sm:$0xff]   ;;  %v1690_v31 = vld [vmem:[#allocation7 + $0x90] ss:$8 sps:$4 sm:$0xff]   ;;  %v1691_v32 = vld [vmem:[#allocation7 + $0xa4] ss:$8 sps:$4 sm:$0xff]  }
  0x55   :  { %156 = vmatprep.subr.bf16.mxu0 %v1658_v9  ;;  %v1693_v33 = vld [vmem:[#allocation7 + $0xa0] ss:$8 sps:$4 sm:$0xff]   ;;  %v1694_v34 = vld [vmem:[#allocation7 + $0xb4] ss:$8 sps:$4 sm:$0xff]   ;;  %v1696_v35 = vld [vmem:[#allocation7 + $0xb0] ss:$8 sps:$4 sm:$0xff]   ;;  %v96_v9 = vlaneseq }
  0x56   :  { %v1697_v36 = vld [vmem:[#allocation7 + $0xc4] ss:$8 sps:$4 sm:$0xff]   ;;  %v1699_v37 = vld [vmem:[#allocation7 + $0xc0] ss:$8 sps:$4 sm:$0xff]   ;;  %v1700_v38 = vld [vmem:[#allocation7 + $0xd4] ss:$8 sps:$4 sm:$0xff]  }
  0x57   :  { %408 = vmatpush1.bf16.msra.mxu1 %v1669_v16  ;;  %v1702_v39 = vld [vmem:[#allocation7 + $0xd0] ss:$8 sps:$4 sm:$0xff]   ;;  %v1703_v40 = vld [vmem:[#allocation7 + $0xe4] ss:$8 sps:$4 sm:$0xff]   ;;  %v1705_v41 = vld [vmem:[#allocation7 + $0xe0] ss:$8 sps:$4 sm:$0xff]  }
  0x58   :  { %157 = vmatpush1.bf16.msra.mxu0 %v1660_v11  ;;  %409 = vmatprep.subr.bf16.mxu1 %v1670_v18  ;;  %v1706_v42 = vld [vmem:[#allocation7 + $0xf4] ss:$8 sps:$4 sm:$0xff]   ;;  %v1708_v43 = vld [vmem:[#allocation7 + $0xf0] ss:$8 sps:$4 sm:$0xff]   ;;  %v1711_v45 = vld [vmem:[#allocation8 + $0x4] ss:$28 sps:$4 sm:$0xff]  }
  0x59   :  { %v1709_v44 = vld [vmem:[#allocation8] ss:$28 sps:$4 sm:$0xff]   ;;  %v1714_v46 = vld [vmem:[#allocation8 + $0xc] ss:$28 sps:$4 sm:$0xff]   ;;  %1156 = vmatprep.subr.bf16.mxu0 %v1711_v45  ;;  %v1715_v48 = vld [vmem:[#allocation8 + $0x38] ss:$28 sps:$4 sm:$0xff]  }
  0x5a   :  { %v1717_v47 = vld [vmem:[#allocation8 + $0x3c] ss:$28 sps:$4 sm:$0xff]   ;;  %v1723_v49 = vld [vmem:[#allocation8 + $0x74] ss:$28 sps:$4 sm:$0xff]   ;;  %v1729_v51 = vld [vmem:[#allocation8 + $0xac] ss:$28 sps:$4 sm:$0xff]  }
  0x5b   :  { %1464 = vmatmul.mubr.msk.bf16.vlgmr.msra.gmra.mrb[0].mxu0 %vm146_vm0, %v85_v17  ;;  %410 = vmatpush1.bf16.msra.mxu1 %v1672_v19  ;;  %v1721_v50 = vld [vmem:[#allocation8 + $0x70] ss:$28 sps:$4 sm:$0xff]   ;;  %v1727_v52 = vld [vmem:[#allocation8 + $0xa8] ss:$28 sps:$4 sm:$0xff]   ;;  %v1733_v54 = vld [vmem:[#allocation8 + $0xe0] ss:$28 sps:$4 sm:$0xff]  }
  0x5c   :  { %411 = vmatprep.subr.bf16.mxu1 %v1673_v20  ;;  %1157 = vmatpush1.bf16.msra.mxu0 %v1709_v44  ;;  %v1735_v53 = vld [vmem:[#allocation8 + $0xe4] ss:$28 sps:$4 sm:$0xff]   ;;  %v1741_v55 = vld [vmem:[#allocation8 + $0x11c] ss:$28 sps:$4 sm:$0xff]   ;;  %v1747_v57 = vld [vmem:[#allocation8 + $0x154] ss:$28 sps:$4 sm:$0xff]  }
  0x5d   :  { %1158 = vmatprep.subr.bf16.mxu0 %v1717_v47  ;;  %v1739_v56 = vld [vmem:[#allocation8 + $0x118] ss:$28 sps:$4 sm:$0xff]   ;;  %v1745_v58 = vld [vmem:[#allocation8 + $0x150] ss:$28 sps:$4 sm:$0xff]   ;;  %v1751_v60 = vld [vmem:[#allocation8 + $0x188] ss:$28 sps:$4 sm:$0xff]  }
  0x5e   :  { %v1753_v59 = vld [vmem:[#allocation8 + $0x18c] ss:$28 sps:$4 sm:$0xff]   ;;  %v1759_v61 = vld [vmem:[#allocation8 + $0x1c4] ss:$28 sps:$4 sm:$0xff]   ;;  %v1765_v63 = vld [vmem:[#allocation8 + $0x1fc] ss:$28 sps:$4 sm:$0xff]  }
  0x5f   :  { %412 = vmatpush1.bf16.msra.mxu1 %v1675_v21  ;;  %v1757_v62 = vld [vmem:[#allocation8 + $0x1c0] ss:$28 sps:$4 sm:$0xff]   ;;  %v1763_v0 = vld [vmem:[#allocation8 + $0x1f8] ss:$28 sps:$4 sm:$0xff]   ;;  %v1769_v2 = vld [vmem:[#allocation8 + $0x230] ss:$28 sps:$4 sm:$0xff]  }
  0x60   :  { %413 = vmatprep.subr.bf16.mxu1 %v1676_v22  ;;  %1159 = vmatpush1.bf16.msra.mxu0 %v1715_v48  ;;  %v1771_v1 = vld [vmem:[#allocation8 + $0x234] ss:$28 sps:$4 sm:$0xff]   ;;  %v1777_v3 = vld [vmem:[#allocation8 + $0x26c] ss:$28 sps:$4 sm:$0xff]   ;;  %v1783_v5 = vld [vmem:[#allocation8 + $0x2a4] ss:$28 sps:$4 sm:$0xff]  }
  0x61   :  { %1160 = vmatprep.subr.bf16.mxu0 %v1723_v49  ;;  %v1775_v4 = vld [vmem:[#allocation8 + $0x268] ss:$28 sps:$4 sm:$0xff]   ;;  %v1781_v6 = vld [vmem:[#allocation8 + $0x2a0] ss:$28 sps:$4 sm:$0xff]   ;;  %v1787_v8 = vld [vmem:[#allocation8 + $0x2d8] ss:$28 sps:$4 sm:$0xff]  }
  0x62   :  { %v1789_v7 = vld [vmem:[#allocation8 + $0x2dc] ss:$28 sps:$4 sm:$0xff]   ;;  %v2125_v10 = vshrl.u32 %v96_v9, 7  ;;  %v94_v12 = vld [vmem:[%s2185_s2] sm:$0x3] }
  0x63   :  { %414 = vmatpush1.bf16.msra.mxu1 %v1678_v23  ;;  %v1754_v44 = vld [vmem:[#allocation8 + $0x190] ss:$28 sps:$4 sm:$0xff]   ;;  %v1768_v47 = vld [vmem:[#allocation8 + $0x204] ss:$28 sps:$4 sm:$0xff]   ;;  %v1774_v49 = vld [vmem:[#allocation8 + $0x23c] ss:$28 sps:$4 sm:$0xff]  }
  0x64   :  { %415 = vmatprep.subr.bf16.mxu1 %v1679_v24  ;;  %1161 = vmatpush1.bf16.msra.mxu0 %v1721_v50  ;;  %v2128_v11 = vsub.s32 0, %v2125_v10  ;;  %v2134_v13 = vsub.s32 1, %v2125_v10  ;;  %v1762_v45 = vld [vmem:[#allocation8 + $0x1cc] ss:$28 sps:$4 sm:$0xff]   ;;  %v1766_v48 = vld [vmem:[#allocation8 + $0x200] ss:$28 sps:$4 sm:$0xff]  }
  0x65   :  { %1162 = vmatprep.subr.bf16.mxu0 %v1729_v51  ;;  %v1772_v50 = vld [vmem:[#allocation8 + $0x238] ss:$28 sps:$4 sm:$0xff]  }
  0x66   :  { %v99_v14 = vrot.slane %v94_v12, %v2128_v11  ;;  %v103_v15 = vrot.slane %v94_v12, %v2134_v13  ;;  %v1780_v51 = vld [vmem:[#allocation8 + $0x274] ss:$28 sps:$4 sm:$0xff]  }
  0x67   :  { %416 = vmatpush1.bf16.msra.mxu1 %v1681_v25 }
  0x68   :  { %417 = vmatprep.subr.bf16.mxu1 %v1682_v26  ;;  %1163 = vmatpush1.bf16.msra.mxu0 %v1727_v52  ;;  %v1778_v52 = vld [vmem:[#allocation8 + $0x270] ss:$28 sps:$4 sm:$0xff]  }
  0x69   :  { %1164 = vmatprep.subr.bf16.mxu0 %v1735_v53  ;;  %v1786_v53 = vld [vmem:[#allocation8 + $0x2ac] ss:$28 sps:$4 sm:$0xff]  }
  0x6b   :  { %418 = vmatpush1.bf16.msra.mxu1 %v1684_v27 }
  0x6c   :  { %419 = vmatprep.subr.bf16.mxu1 %v1685_v28  ;;  %1165 = vmatpush1.bf16.msra.mxu0 %v1733_v54  ;;  %v1784_v54 = vld [vmem:[#allocation8 + $0x2a8] ss:$28 sps:$4 sm:$0xff]  }
  0x6d   :  { %1166 = vmatprep.subr.bf16.mxu0 %v1741_v55  ;;  %v1792_v55 = vld [vmem:[#allocation8 + $0x2e4] ss:$28 sps:$4 sm:$0xff]  }
  0x6f   :  { %420 = vmatpush1.bf16.msra.mxu1 %v1687_v29 }
  0x70   :  { %421 = vmatprep.subr.bf16.mxu1 %v1688_v30  ;;  %1167 = vmatpush1.bf16.msra.mxu0 %v1739_v56  ;;  %v1712_v30 = vld [vmem:[#allocation8 + $0x8] ss:$28 sps:$4 sm:$0xff]   ;;  %v1790_v56 = vld [vmem:[#allocation8 + $0x2e0] ss:$28 sps:$4 sm:$0xff]  }
  0x71   :  { %1168 = vmatprep.subr.bf16.mxu0 %v1747_v57  ;;  %v1795_v57 = vld [vmem:[#allocation8 + $0x314] ss:$28 sps:$4 sm:$0xff]  }
  0x73   :  { %422 = vmatpush1.bf16.msra.mxu1 %v1690_v31  ;;  %v1720_v31 = vld [vmem:[#allocation8 + $0x44] ss:$28 sps:$4 sm:$0xff]  }
  0x74   :  { %423 = vmatprep.subr.bf16.mxu1 %v1691_v32  ;;  %1169 = vmatpush1.bf16.msra.mxu0 %v1745_v58  ;;  %v1718_v32 = vld [vmem:[#allocation8 + $0x40] ss:$28 sps:$4 sm:$0xff]  }
  0x75   :  { %1170 = vmatprep.subr.bf16.mxu0 %v1753_v59  ;;  %v1798_v58 = vld [vmem:[#allocation8 + $0x31c] ss:$28 sps:$4 sm:$0xff]   ;;  %v1793_v59 = vld [vmem:[#allocation8 + $0x310] ss:$28 sps:$4 sm:$0xff]  }
  0x77   :  { %424 = vmatpush1.bf16.msra.mxu1 %v1693_v33  ;;  %v1726_v33 = vld [vmem:[#allocation8 + $0x7c] ss:$28 sps:$4 sm:$0xff]  }
  0x78   :  { %425 = vmatprep.subr.bf16.mxu1 %v1694_v34  ;;  %1171 = vmatpush1.bf16.msra.mxu0 %v1751_v60  ;;  %v1724_v34 = vld [vmem:[#allocation8 + $0x78] ss:$28 sps:$4 sm:$0xff]  }
  0x79   :  { %1172 = vmatprep.subr.bf16.mxu0 %v1759_v61  ;;  %v1796_v60 = vld [vmem:[#allocation8 + $0x318] ss:$28 sps:$4 sm:$0xff]   ;;  %v1801_v61 = vld [vmem:[#allocation8 + $0x34c] ss:$28 sps:$4 sm:$0xff]  }
  0x7b   :  { %426 = vmatpush1.bf16.msra.mxu1 %v1696_v35  ;;  %v1732_v35 = vld [vmem:[#allocation8 + $0xb4] ss:$28 sps:$4 sm:$0xff]  }
  0x7c   :  { %427 = vmatprep.subr.bf16.mxu1 %v1697_v36  ;;  %1173 = vmatpush1.bf16.msra.mxu0 %v1757_v62  ;;  %v1730_v36 = vld [vmem:[#allocation8 + $0xb0] ss:$28 sps:$4 sm:$0xff]  }
  0x7d   :  { %1174 = vmatprep.subr.bf16.mxu0 %v1765_v63  ;;  %v1804_v62 = vld [vmem:[#allocation8 + $0x354] ss:$28 sps:$4 sm:$0xff]   ;;  %v1799_v63 = vld [vmem:[#allocation8 + $0x348] ss:$28 sps:$4 sm:$0xff]  }
  0x7f   :  { %428 = vmatpush1.bf16.msra.mxu1 %v1699_v37  ;;  %v1738_v37 = vld [vmem:[#allocation8 + $0xec] ss:$28 sps:$4 sm:$0xff]  }
  0x80   :  { %429 = vmatprep.subr.bf16.mxu1 %v1700_v38  ;;  %1175 = vmatpush1.bf16.msra.mxu0 %v1763_v0  ;;  %v1736_v38 = vld [vmem:[#allocation8 + $0xe8] ss:$28 sps:$4 sm:$0xff]   ;;  %v1802_v0 = vld [vmem:[#allocation8 + $0x350] ss:$28 sps:$4 sm:$0xff]  }
  0x81   :  { %1176 = vmatprep.subr.bf16.mxu0 %v1771_v1  ;;  %v1807_v1 = vld [vmem:[#allocation8 + $0x14] ss:$28 sps:$4 sm:$0xff]  }
  0x83   :  { %430 = vmatpush1.bf16.msra.mxu1 %v1702_v39  ;;  %v1744_v39 = vld [vmem:[#allocation8 + $0x124] ss:$28 sps:$4 sm:$0xff]  }
  0x84   :  { %431 = vmatprep.subr.bf16.mxu1 %v1703_v40  ;;  %1177 = vmatpush1.bf16.msra.mxu0 %v1769_v2  ;;  %v1742_v40 = vld [vmem:[#allocation8 + $0x120] ss:$28 sps:$4 sm:$0xff]   ;;  %v1808_v2 = vld [vmem:[#allocation8 + $0x1d8] ss:$28 sps:$4 sm:$0xff]  }
  0x85   :  { %1178 = vmatprep.subr.bf16.mxu0 %v1777_v3  ;;  %v231_v3 = vld [vmem:[%s2187_s4] sm:$0x3] }
  0x87   :  { %432 = vmatpush1.bf16.msra.mxu1 %v1705_v41  ;;  %v1750_v41 = vld [vmem:[#allocation8 + $0x15c] ss:$28 sps:$4 sm:$0xff]  }
  0x88   :  { %433 = vmatprep.subr.bf16.mxu1 %v1706_v42  ;;  %1179 = vmatpush1.bf16.msra.mxu0 %v1775_v4  ;;  %v1748_v42 = vld [vmem:[#allocation8 + $0x158] ss:$28 sps:$4 sm:$0xff]   ;;  %v236_v4 = vrot.slane %v231_v3, %v2128_v11 }
  0x89   :  { %1180 = vmatprep.subr.bf16.mxu0 %v1783_v5  ;;  %v240_v5 = vrot.slane %v231_v3, %v2134_v13  ;;  %v1868_v3 = vld [vmem:[#allocation8 + $0x35c] ss:$28 sps:$4 sm:$0xff]  }
  0x8b   :  { %434 = vmatpush1.bf16.msra.mxu1 %v1708_v43  ;;  %v1756_v43 = vld [vmem:[#allocation8 + $0x194] ss:$28 sps:$4 sm:$0xff]  }
  0x8c   :  { %1199 = vmatprep.subr.bf16.mxu1 %v1714_v46  ;;  %1181 = vmatpush1.bf16.msra.mxu0 %v1781_v6  ;;  %v1760_v46 = vld [vmem:[#allocation8 + $0x1c8] ss:$28 sps:$4 sm:$0xff]  }
  0x8d   :  { %1182 = vmatprep.subr.bf16.mxu0 %v1789_v7 }
  0x90   :  { %1183 = vmatpush1.bf16.msra.mxu0 %v1787_v8 }
  0x91   :  { %1184 = vmatprep.subr.bf16.mxu0 %v1795_v57  ;;  %v1853_v57 = vld [vmem:[#allocation8 + $0x244] ss:$28 sps:$4 sm:$0xff]  }
  0x94   :  { %1185 = vmatpush1.bf16.msra.mxu0 %v1793_v59  ;;  %v1856_v59 = vld [vmem:[#allocation8 + $0x27c] ss:$28 sps:$4 sm:$0xff]  }
  0x95   :  { %1186 = vmatprep.subr.bf16.mxu0 %v1801_v61  ;;  %v1859_v61 = vld [vmem:[#allocation8 + $0x2b4] ss:$28 sps:$4 sm:$0xff]  }
  0x98   :  { %1187 = vmatpush1.bf16.msra.mxu0 %v1799_v63  ;;  %v1862_v63 = vld [vmem:[#allocation8 + $0x2ec] ss:$28 sps:$4 sm:$0xff]  }
  0x99   :  { %1242 = vmatprep.subr.bf16.mxu0 %v1807_v1  ;;  %v1865_v1 = vld [vmem:[#allocation8 + $0x324] ss:$28 sps:$4 sm:$0xff]  }
 0x12e   :  { %v184_v16 = vpop.f32.mrb[0].mxu0 }
 0x12f   :  { %v185_v17 = vadd.f32 %v184_v16, %v99_v14  ;;  %v186_v18 = vpop.f32.mrb[1].mxu0 }
 0x130   :  { %v187_v19 = vadd.f32 %v186_v18, %v103_v15  ;;  %v188_v20 = vpop.f32.mrb[2].mxu0 }
 0x131   :  { %v189_v21 = vadd.f32 %v188_v20, %v99_v14  ;;  %v190_v22 = vpop.f32.mrb[3].mxu0  ;;  %v193_v24 = vmax.f32 %v185_v17, 0.0 }
 0x132   :  { %v191_v23 = vadd.f32 %v190_v22, %v103_v15  ;;  %v194_v26 = vmax.f32 %v187_v19, 0.0 }
 0x133   :  { %v195_v25 = vmax.f32 %v189_v21, 0.0 }
 0x134   :  { %v196_v27 = vmax.f32 %v191_v23, 0.0  ;;  %v1805_v23 = vld [vmem:[#allocation8 + $0x10] ss:$28 sps:$4 sm:$0xff]  }
 0x135   :  { %v197_v28 = vpack.c.bf16 %v195_v25, %v193_v24  ;;  %v1809_v24 = vld [vmem:[#allocation8 + $0x18] ss:$28 sps:$4 sm:$0xff]   ;;  %v1812_v25 = vld [vmem:[#allocation8 + $0x4c] ss:$28 sps:$4 sm:$0xff]  }
 0x136   :  { %v198_v29 = vpack.c.bf16 %v196_v27, %v194_v26  ;;  %v1813_v26 = vld [vmem:[#allocation8 + $0x210] ss:$28 sps:$4 sm:$0xff]   ;;  %v1810_v27 = vld [vmem:[#allocation8 + $0x48] ss:$28 sps:$4 sm:$0xff]  }
 0x138   :  { %435 = vmatprep.mubr.bf16.mxu1 %v198_v29  ;;  %v1817_v29 = vld [vmem:[#allocation8 + $0x84] ss:$28 sps:$4 sm:$0xff]  }
 0x139   :  { %436 = vmatmul.mubr.bf16.vlgmr.msra.gmra.mrb[0].mxu1 %v197_v28  ;;  %v1814_v28 = vld [vmem:[#allocation8 + $0x50] ss:$28 sps:$4 sm:$0xff]  }
 0x13a   :  { %1200 = vmatpush1.bf16.msra.mxu1 %v1712_v30  ;;  %v1818_v30 = vld [vmem:[#allocation8 + $0x248] ss:$28 sps:$4 sm:$0xff]  }
 0x13b   :  { %1201 = vmatprep.subr.bf16.mxu1 %v1720_v31  ;;  %v1815_v31 = vld [vmem:[#allocation8 + $0x80] ss:$28 sps:$4 sm:$0xff]  }
 0x13e   :  { %1202 = vmatpush1.bf16.msra.mxu1 %v1718_v32  ;;  %v1819_v32 = vld [vmem:[#allocation8 + $0x88] ss:$28 sps:$4 sm:$0xff]  }
 0x13f   :  { %1203 = vmatprep.subr.bf16.mxu1 %v1726_v33  ;;  %v1822_v33 = vld [vmem:[#allocation8 + $0xbc] ss:$28 sps:$4 sm:$0xff]  }
 0x142   :  { %1204 = vmatpush1.bf16.msra.mxu1 %v1724_v34  ;;  %v1823_v34 = vld [vmem:[#allocation8 + $0x280] ss:$28 sps:$4 sm:$0xff]  }
 0x143   :  { %1205 = vmatprep.subr.bf16.mxu1 %v1732_v35  ;;  %v1820_v35 = vld [vmem:[#allocation8 + $0xb8] ss:$28 sps:$4 sm:$0xff]  }
 0x146   :  { %1206 = vmatpush1.bf16.msra.mxu1 %v1730_v36  ;;  %v1824_v36 = vld [vmem:[#allocation8 + $0xc0] ss:$28 sps:$4 sm:$0xff]  }
 0x147   :  { %1207 = vmatprep.subr.bf16.mxu1 %v1738_v37  ;;  %v1827_v37 = vld [vmem:[#allocation8 + $0xf4] ss:$28 sps:$4 sm:$0xff]  }
 0x14a   :  { %1208 = vmatpush1.bf16.msra.mxu1 %v1736_v38  ;;  %v1828_v38 = vld [vmem:[#allocation8 + $0x2b8] ss:$28 sps:$4 sm:$0xff]  }
 0x14b   :  { %1209 = vmatprep.subr.bf16.mxu1 %v1744_v39  ;;  %v1825_v39 = vld [vmem:[#allocation8 + $0xf0] ss:$28 sps:$4 sm:$0xff]  }
 0x14e   :  { %1210 = vmatpush1.bf16.msra.mxu1 %v1742_v40  ;;  %v1829_v40 = vld [vmem:[#allocation8 + $0xf8] ss:$28 sps:$4 sm:$0xff]  }
 0x14f   :  { %1211 = vmatprep.subr.bf16.mxu1 %v1750_v41  ;;  %v1832_v41 = vld [vmem:[#allocation8 + $0x12c] ss:$28 sps:$4 sm:$0xff]  }
 0x152   :  { %1212 = vmatpush1.bf16.msra.mxu1 %v1748_v42  ;;  %v1833_v42 = vld [vmem:[#allocation8 + $0x2f0] ss:$28 sps:$4 sm:$0xff]  }
 0x153   :  { %1213 = vmatprep.subr.bf16.mxu1 %v1756_v43  ;;  %v1830_v43 = vld [vmem:[#allocation8 + $0x128] ss:$28 sps:$4 sm:$0xff]  }
 0x156   :  { %1214 = vmatpush1.bf16.msra.mxu1 %v1754_v44  ;;  %v1834_v44 = vld [vmem:[#allocation8 + $0x130] ss:$28 sps:$4 sm:$0xff]  }
 0x157   :  { %1215 = vmatprep.subr.bf16.mxu1 %v1762_v45  ;;  %v1837_v45 = vld [vmem:[#allocation8 + $0x164] ss:$28 sps:$4 sm:$0xff]  }
 0x15a   :  { %1216 = vmatpush1.bf16.msra.mxu1 %v1760_v46  ;;  %v1838_v46 = vld [vmem:[#allocation8 + $0x328] ss:$28 sps:$4 sm:$0xff]  }
 0x15b   :  { %1217 = vmatprep.subr.bf16.mxu1 %v1768_v47  ;;  %v1835_v47 = vld [vmem:[#allocation8 + $0x160] ss:$28 sps:$4 sm:$0xff]  }
 0x15e   :  { %1218 = vmatpush1.bf16.msra.mxu1 %v1766_v48  ;;  %v1839_v48 = vld [vmem:[#allocation8 + $0x168] ss:$28 sps:$4 sm:$0xff]  }
 0x15f   :  { %1219 = vmatprep.subr.bf16.mxu1 %v1774_v49  ;;  %v1842_v49 = vld [vmem:[#allocation8 + $0x19c] ss:$28 sps:$4 sm:$0xff]  }
 0x162   :  { %1220 = vmatpush1.bf16.msra.mxu1 %v1772_v50  ;;  %v1843_v50 = vld [vmem:[#allocation8 + $0x360] ss:$28 sps:$4 sm:$0xff]  }
 0x163   :  { %1221 = vmatprep.subr.bf16.mxu1 %v1780_v51  ;;  %v1840_v51 = vld [vmem:[#allocation8 + $0x198] ss:$28 sps:$4 sm:$0xff]  }
 0x166   :  { %1222 = vmatpush1.bf16.msra.mxu1 %v1778_v52  ;;  %v1844_v52 = vld [vmem:[#allocation8 + $0x1a0] ss:$28 sps:$4 sm:$0xff]  }
 0x167   :  { %1223 = vmatprep.subr.bf16.mxu1 %v1786_v53  ;;  %v1847_v53 = vld [vmem:[#allocation8 + $0x1d4] ss:$28 sps:$4 sm:$0xff]  }
 0x16a   :  { %1224 = vmatpush1.bf16.msra.mxu1 %v1784_v54  ;;  %v1845_v54 = vld [vmem:[#allocation8 + $0x1d0] ss:$28 sps:$4 sm:$0xff]  }
 0x16b   :  { %1225 = vmatprep.subr.bf16.mxu1 %v1792_v55  ;;  %v1850_v55 = vld [vmem:[#allocation8 + $0x20c] ss:$28 sps:$4 sm:$0xff]  }
 0x16e   :  { %1226 = vmatpush1.bf16.msra.mxu1 %v1790_v56  ;;  %v1848_v56 = vld [vmem:[#allocation8 + $0x208] ss:$28 sps:$4 sm:$0xff]  }
 0x16f   :  { %1227 = vmatprep.subr.bf16.mxu1 %v1798_v58  ;;  %v1851_v58 = vld [vmem:[#allocation8 + $0x240] ss:$28 sps:$4 sm:$0xff]  }
 0x172   :  { %1228 = vmatpush1.bf16.msra.mxu1 %v1796_v60  ;;  %v1854_v60 = vld [vmem:[#allocation8 + $0x278] ss:$28 sps:$4 sm:$0xff]  }
 0x173   :  { %1229 = vmatprep.subr.bf16.mxu1 %v1804_v62  ;;  %v1857_v62 = vld [vmem:[#allocation8 + $0x2b0] ss:$28 sps:$4 sm:$0xff]  }
 0x176   :  { %1230 = vmatpush1.bf16.msra.mxu1 %v1802_v0  ;;  %v1860_v0 = vld [vmem:[#allocation8 + $0x2e8] ss:$28 sps:$4 sm:$0xff]  }
 0x177   :  { %1617 = vmatprep.subr.bf16.mxu1 %v1808_v2  ;;  %v1863_v2 = vld [vmem:[#allocation8 + $0x320] ss:$28 sps:$4 sm:$0xff]  }
 0x20c   :  { %v437_v6 = vpop.f32.mrb[0].mxu1 }
 0x20d   :  { %v438_v7 = vadd.f32 %v437_v6, %v236_v4  ;;  %v439_v8 = vpop.f32.mrb[1].mxu1  ;;  %v2153_v6 = vld [vmem:[%s2189_s6] sm:$0x7f]  ;;  %s2010_s6 = smov [#allocation10]  }
 0x20e   :  { %v440_v9 = vadd.f32 %v439_v8, %v240_v5  ;;  %v441_v12 = vpop.f32.mrb[2].mxu1  ;;  %v1331_v8 = vrot.slane %v2153_v6, %v2128_v11  ;;  %s1442_s30 = sshll.u32 %s2010_s6, 4  ;;  %s1443_s30 = int_to_ptr.vmem [resolvable:$true] %s1442_s30 }
 0x20f   :  { %v442_v14 = vadd.f32 %v441_v12, %v236_v4  ;;  %v443_v15 = vpop.f32.mrb[3].mxu1  ;;  %v446_v17 = vmax.f32 %v438_v7, 0.0  ;;  %v1866_v4 = vld [vmem:[#allocation8 + $0x358] ss:$28 sps:$4 sm:$0xff]   ;;  %v1342_v7 = vsub.s32 3, %v2125_v10  ;;  %s1971_s8 = scalar_lea.vmem %s1443_s30, 896  ;;  %p1976_p5 = scmp.lt.s32.totalorder %s1443_s30, %s1443_s30 }
 0x210   :  { %v444_v16 = vadd.f32 %v443_v15, %v240_v5  ;;  %v447_v19 = vmax.f32 %v440_v9, 0.0  ;;  %v1338_v5 = vsub.s32 2, %v2125_v10  ;;  %v1335_v15 = vrot.slane %v2153_v6, %v2134_v13  ;;  %p1972_p4 = scmp.ne.s32.totalorder %s1443_s30, %s1971_s8  ;;  %p1977_p6 = scmp.lt.s32.totalorder %s1971_s8, %s1971_s8 }
 0x211   :  { %v448_v18 = vmax.f32 %v442_v14, 0.0 }
 0x212   :  { %v449_v20 = vmax.f32 %v444_v16, 0.0  ;;  %v1339_v9 = vrot.slane %v2153_v6, %v1338_v5  ;;  %v1343_v16 = vrot.slane %v2153_v6, %v1342_v7  ;;  %p1978_p7 = por %p1977_p6, %p1976_p5 }
 0x213   :  { %v2143_v21 = vpack.c.bf16 %v448_v18, %v446_v17 }
 0x214   :  { %v451_v22 = vpack.c.bf16 %v449_v20, %v447_v19  ;;  %p1979_p8 = pnand %p1978_p7, %p1972_p4 }
 0x216   :  { %1188 = vmatprep.mubr.bf16.mxu0 %v451_v22  ;;  %1231 = vmatprep.mubr.bf16.mxu1 %v451_v22 }
 0x217   :  { %1189 = vmatmul.mubr.bf16.vlgmr.msra.gmra.mrb[4].mxu0 %v2143_v21  ;;  %1232 = vmatmul.mubr.bf16.vlgmr.msra.gmra.mrb[4].mxu1 %v2143_v21 }
 0x218   :  { %1243 = vmatpush1.bf16.msra.mxu0 %v1805_v23  ;;  %1618 = vmatpush3.bf16.msra.mxu1 %v1809_v24 }
 0x219   :  { %1274 = vmatprep.mubr.bf16.mxu0 %v451_v22  ;;  %1317 = vmatprep.mubr.bf16.mxu1 %v451_v22 }
 0x21a   :  { %1244 = vmatprep.subr.bf16.mxu0 %v1812_v25  ;;  %1619 = vmatprep.subr.bf16.mxu1 %v1813_v26 }
 0x21c   :  { %1245 = vmatpush1.bf16.msra.mxu0 %v1810_v27  ;;  %1620 = vmatpush3.bf16.msra.mxu1 %v1814_v28 }
 0x21d   :  { %1246 = vmatprep.subr.bf16.mxu0 %v1817_v29  ;;  %1621 = vmatprep.subr.bf16.mxu1 %v1818_v30 }
 0x220   :  { %1247 = vmatpush1.bf16.msra.mxu0 %v1815_v31  ;;  %1622 = vmatpush3.bf16.msra.mxu1 %v1819_v32 }
 0x221   :  { %1248 = vmatprep.subr.bf16.mxu0 %v1822_v33  ;;  %1623 = vmatprep.subr.bf16.mxu1 %v1823_v34 }
 0x224   :  { %1249 = vmatpush1.bf16.msra.mxu0 %v1820_v35  ;;  %1624 = vmatpush3.bf16.msra.mxu1 %v1824_v36 }
 0x225   :  { %1250 = vmatprep.subr.bf16.mxu0 %v1827_v37  ;;  %1625 = vmatprep.subr.bf16.mxu1 %v1828_v38 }
 0x228   :  { %1251 = vmatpush1.bf16.msra.mxu0 %v1825_v39  ;;  %1626 = vmatpush3.bf16.msra.mxu1 %v1829_v40 }
 0x229   :  { %1252 = vmatprep.subr.bf16.mxu0 %v1832_v41  ;;  %1627 = vmatprep.subr.bf16.mxu1 %v1833_v42  ;;  %v1354_v41 = vsub.s32 6, %v2125_v10 }
 0x22c   :  { %1253 = vmatpush1.bf16.msra.mxu0 %v1830_v43  ;;  %1628 = vmatpush3.bf16.msra.mxu1 %v1834_v44 }
 0x22d   :  { %1254 = vmatprep.subr.bf16.mxu0 %v1837_v45  ;;  %1629 = vmatprep.subr.bf16.mxu1 %v1838_v46  ;;  %v1355_v45 = vrot.slane %v2153_v6, %v1354_v41 }
 0x230   :  { %1255 = vmatpush1.bf16.msra.mxu0 %v1835_v47  ;;  %1630 = vmatpush3.bf16.msra.mxu1 %v1839_v48 }
 0x231   :  { %1256 = vmatprep.subr.bf16.mxu0 %v1842_v49  ;;  %1631 = vmatprep.subr.bf16.mxu1 %v1843_v50 }
 0x234   :  { %1257 = vmatpush1.bf16.msra.mxu0 %v1840_v51  ;;  %1632 = vmatpush3.bf16.msra.mxu1 %v1844_v52 }
 0x235   :  { %1258 = vmatprep.subr.bf16.mxu0 %v1847_v53 }
 0x237   :  { %1318 = vmatmul.mubr.bf16.vlgmr.msra.gmra.mrb[8].mxu1 %v2143_v21 }
 0x238   :  { %1259 = vmatpush1.bf16.msra.mxu0 %v1845_v54 }
 0x239   :  { %1260 = vmatprep.subr.bf16.mxu0 %v1850_v55  ;;  %v1346_v55 = vsub.s32 4, %v2125_v10 }
 0x23c   :  { %1261 = vmatpush1.bf16.msra.mxu0 %v1848_v56  ;;  %v1350_v56 = vsub.s32 5, %v2125_v10 }
 0x23d   :  { %1262 = vmatprep.subr.bf16.mxu0 %v1853_v57  ;;  %v1347_v57 = vrot.slane %v2153_v6, %v1346_v55 }
 0x240   :  { %1263 = vmatpush1.bf16.msra.mxu0 %v1851_v58 }
 0x241   :  { %1264 = vmatprep.subr.bf16.mxu0 %v1856_v59  ;;  %v1351_v59 = vrot.slane %v2153_v6, %v1350_v56 }
 0x244   :  { %1265 = vmatpush1.bf16.msra.mxu0 %v1854_v60 }
 0x245   :  { %1266 = vmatprep.subr.bf16.mxu0 %v1859_v61 }
 0x248   :  { %1267 = vmatpush1.bf16.msra.mxu0 %v1857_v62 }
 0x249   :  { %1268 = vmatprep.subr.bf16.mxu0 %v1862_v63 }
 0x24c   :  { %1269 = vmatpush1.bf16.msra.mxu0 %v1860_v0 }
 0x24d   :  { %1270 = vmatprep.subr.bf16.mxu0 %v1865_v1 }
 0x250   :  { %1271 = vmatpush1.bf16.msra.mxu0 %v1863_v2 }
 0x251   :  { %1272 = vmatprep.subr.bf16.mxu0 %v1868_v3 }
 0x254   :  { %1273 = vmatpush1.bf16.msra.mxu0 %v1866_v4 }
 0x257   :  { %1275 = vmatmul.mubr.bf16.vlgmr.msra.gmra.mrb[8].mxu0 %v2143_v21 }
 0x2ea   :  { %v1190_v12 = vpop.f32.mrb[4].mxu0  ;;  %v1233_v14 = vpop.f32.mrb[4].mxu1 }
 0x2eb   :  { %v1192_v17 = vpop.f32.mrb[5].mxu0  ;;  %v1235_v18 = vpop.f32.mrb[5].mxu1  ;;  %v1363_v21 = vadd.f32 %v1331_v8, %v1190_v12  ;;  %v1365_v22 = vadd.f32 %v1339_v9, %v1233_v14 }
 0x2ec   :  { %v1194_v19 = vpop.f32.mrb[6].mxu0  ;;  %v1237_v20 = vpop.f32.mrb[6].mxu1  ;;  %v1364_v11 = vadd.f32 %v1335_v15, %v1192_v17  ;;  %v1366_v27 = vadd.f32 %v1343_v16, %v1235_v18 }
 0x2ed   :  { %v1370_v23 = vadd.f32 %v1331_v8, %v1194_v19  ;;  %v1372_v24 = vadd.f32 %v1339_v9, %v1237_v20  ;;  %v1196_v25 = vpop.f32.mrb[7].mxu0  ;;  %v1239_v26 = vpop.f32.mrb[7].mxu1 }
 0x2ee   :  { %v1371_v28 = vadd.f32 %v1335_v15, %v1196_v25  ;;  %v1373_v29 = vadd.f32 %v1343_v16, %v1239_v26 }
 0x2ef   :  { %v1377_v30 = vpack.c.bf16 %v1370_v23, %v1363_v21  ;;  %v1379_v31 = vpack.c.bf16 %v1372_v24, %v1365_v22 }
 0x2f0   :  { %v1378_v32 = vpack.c.bf16 %v1371_v28, %v1364_v11  ;;  %v1380_v13 = vpack.c.bf16 %v1373_v29, %v1366_v27 }
 0x2f1   :  { %1869 = vtanh.bf16 %v1377_v30 }
 0x2f2   :  { %1871 = vtanh.bf16 %v1379_v31 }
 0x2f3   :  { %1873 = vtanh.bf16 %v1378_v32 }
 0x2f4   :  { %1875 = vtanh.bf16 %v1380_v13 }
 0x2fc   :  { %v1870_v33 = vpop.eup %1869 }
 0x2fd   :  { %v1872_v34 = vpop.eup %1871 }
 0x2fe   :  { %v1874_v35 = vpop.eup %1873 }
 0x2ff   :  { %v1876_v36 = vpop.eup %1875  ;;  %v1609_v37 = vcombine.low %v1870_v33, %v1874_v35  ;;  %v1613_v38 = vcombine.high %v1870_v33, %v1874_v35 }
 0x300   :  { %v1610_v39 = vcombine.low %v1872_v34, %v1876_v36  ;;  %v1614_v40 = vcombine.high %v1872_v34, %v1876_v36 }
 0x301   :  { %1428 = vst [vmem:[#allocation10] sm:$0xff] %v1609_v37  ;;  %1433 = vst [vmem:[#allocation10 + $0x1c] sm:$0xff] %v1613_v38 }
 0x302   :  { %1429 = vst [vmem:[#allocation10 + $0x8] sm:$0xff] %v1610_v39  ;;  %1434 = vst [vmem:[#allocation10 + $0x24] sm:$0xff] %v1614_v40 }
 0x30a   :  { %v1633_v42 = vpop.f32.mrb[8].mxu1 }
 0x30b   :  { %v1634_v43 = vpop.f32.mrb[9].mxu1 }
 0x30c   :  { %v1635_v44 = vadd.f32 %v1634_v43, %v1633_v42  ;;  %v1636_v46 = vpop.f32.mrb[10].mxu1 }
 0x30d   :  { %v1637_v47 = vpop.f32.mrb[11].mxu1 }
 0x30e   :  { %v1638_v48 = vadd.f32 %v1637_v47, %v1636_v46  ;;  %v1369_v49 = vadd.f32 %v1635_v44, %v1355_v45 }
 0x310   :  { %v1376_v50 = vadd.f32 %v1638_v48, %v1355_v45 }
 0x312   :  { %v1383_v51 = vpack.c.bf16 %v1376_v50, %v1369_v49 }
 0x314   :  { %1877 = vtanh.bf16 %v1383_v51 }
 0x31f   :  { %v1878_v52 = vpop.eup %1877 }
 0x320   :  { %v1612_v53 = vcombine.low %v1878_v52, %v1878_v52  ;;  %v1616_v54 = vcombine.high %v1878_v52, %v1878_v52 }
 0x322   :  { %1432 = vst.msk [vmem:[#allocation10 + $0x18] sm:$0xf] %vm1431_vm1, %v1612_v53  ;;  %1436 = vst.msk [vmem:[#allocation10 + $0x34] sm:$0xf] %vm1431_vm1, %v1616_v54 }
 0x32a   :  { %v1276_v58 = vpop.f32.mrb[8].mxu0 }
 0x32b   :  { %v1278_v60 = vpop.f32.mrb[9].mxu0  ;;  %v1367_v62 = vadd.f32 %v1347_v57, %v1276_v58 }
 0x32c   :  { %v1280_v61 = vpop.f32.mrb[10].mxu0  ;;  %v1368_v1 = vadd.f32 %v1351_v59, %v1278_v60 }
 0x32d   :  { %v1374_v63 = vadd.f32 %v1347_v57, %v1280_v61  ;;  %v1282_v0 = vpop.f32.mrb[11].mxu0 }
 0x32e   :  { %v1375_v2 = vadd.f32 %v1351_v59, %v1282_v0 }
 0x32f   :  { %v1381_v3 = vpack.c.bf16 %v1374_v63, %v1367_v62 }
 0x330   :  { %v1382_v4 = vpack.c.bf16 %v1375_v2, %v1368_v1 }
 0x331   :  { %1879 = vtanh.bf16 %v1381_v3 }
 0x332   :  { %1881 = vtanh.bf16 %v1382_v4 }
 0x33c   :  { %v1880_v5 = vpop.eup %1879 }
 0x33d   :  { %v1882_v10 = vpop.eup %1881 }
 0x33e   :  { %v1611_v7 = vcombine.low %v1880_v5, %v1882_v10  ;;  %v1615_v8 = vcombine.high %v1880_v5, %v1882_v10 }
 0x340   :  { %1430 = vst [vmem:[#allocation10 + $0x10] sm:$0xff] %v1611_v7  ;;  %1435 = vst [vmem:[#allocation10 + $0x2c] sm:$0xff] %v1615_v8 }
 0x341   :  { %1982 = shalt.err (!%p1979_p8)
}
 0x342   :  { %s1983_s11 = scalar_lea.hbm %s2190_s7, 896 }
 0x343   :  { %p1984_p9 = scmp.ne.s32.totalorder %s2190_s7, %s1983_s11  ;;  %p1987_p10 = scmp.lt.u32.totalorder %s1983_s11, %s2190_s7 }
 0x345   :  { %p1989_p11 = pnand %p1987_p10, %p1984_p9 }
 0x347   :  { %1992 = shalt.err (!%p1989_p11)
}
 0x348   :  { %1448 = dma.vmem_to_hbm [thread:$0]  %s1443_s30, 896, %s2190_s7, [#allocation4], %s2007_s3, %s2007_s3, %s2008_s13  }
 0x349   :  { %1999 = dma.done.wait [#allocation4], 896  }
 0x34a   :  { %2000 = vsyncadd [#allocation4], 4294966400 }
 0x34b   :  { %1452 = vsyncpa [#allocation3], 1 }
 0x34c   :  { %1453 = vsyncpa [#allocation6], 1 }
 0x34d   :  { %1454 = vsyncpa [#allocation9], 1 }
 0x34e   :  { %1455 = vsyncpa [#allocation4], 1 }

</bundles_post_ra>
